<compile_context>
chip_gen: v5e
topology: v5e:2x2
jax: 0.10.0
libtpu: 0.0.40
codegen_flags: <defaults>
</compile_context>

<pallas_src>
import numpy as np
from functools import partial, lru_cache

import jax
import jax.numpy as jnp
from jax.experimental import pallas as pl
from jax.experimental.pallas import tpu as pltpu

BIN_AGG = 8    # block size used by binFunc
LANE = 128     # TPU lane width / lane-tile size


def _round_up(x, m):
    return ((x + m - 1) // m) * m


def _cdiv(a, b):
    return -(-a // b)


# ----------------------------- Pallas kernels ------------------------------

def _binactive_kernel(x_ref, scale_ref, shift_ref, mask_ref, pool_ref, inv_ref,
                      bcast_ref, o_ref, *, apply_affine, apply_mask):
    """binFunc(..., binmat_mul=True) for last-dim > 8 on one (TM, TL) tile.

    x is optionally passed through a per-row affine (fused BatchNorm) and a
    valid-lane mask (zeros ragged / padded lanes).  For every block of 8 lanes:
        out = mean(|x| over the block) * sign(x)
    Block sums use a (TL, NB) 0/1 pooling matmul (bf16 operands, f32 acc); the
    per-block reciprocal counts are applied in f32; means are broadcast back
    with a (NB, TL) 0/1 matmul.
    """
    x = x_ref[...].astype(jnp.float32)
    if apply_affine:                      # fused BatchNorm scale/shift (per row)
        x = x * scale_ref[...] + shift_ref[...]
    if apply_mask:                        # kill invalid lanes (where, not mul,
        x = jnp.where(mask_ref[...] > 0.0, x, 0.0)   # so OOB NaNs cannot leak)
    absx = jnp.abs(x).astype(jnp.bfloat16)
    blk_sum = jnp.dot(absx, pool_ref[...], preferred_element_type=jnp.float32)
    blk_mean = (blk_sum * inv_ref[...]).astype(jnp.bfloat16)
    mean = jnp.dot(blk_mean, bcast_ref[...], preferred_element_type=jnp.float32)
    out = jnp.where(x > 0.0, mean, jnp.where(x < 0.0, -mean, 0.0))
    o_ref[...] = out.astype(o_ref.dtype)


def _matmul_bias_relu_kernel(a_ref, w_ref, b_ref, o_ref):
    """relu(A @ W + b) — FPconv (as im2col matmul) and nn.Linear.

    A and W arrive as bf16; accumulation and the bias add are f32 on the MXU.
    """
    acc = jnp.dot(a_ref[...], w_ref[...], preferred_element_type=jnp.float32)
    o_ref[...] = jnp.maximum(acc + b_ref[...], 0.0).astype(o_ref.dtype)


# ----------------------------- kernel wrappers ------------------------------

@lru_cache(maxsize=None)
def _bin_constants(L, Lp):
    """Host-side (cached) constants for the binactive kernel."""
    NB = Lp // BIN_AGG
    lane = np.arange(Lp)
    pool = (lane[:, None] // BIN_AGG == np.arange(NB)[None, :]).astype(np.float32)
    cnt = np.clip(L - np.arange(NB) * BIN_AGG, 1, BIN_AGG).astype(np.float32)
    inv = (1.0 / cnt).reshape(1, NB)                 # padded blocks: don't-care
    mask = (lane < L).astype(np.float32).reshape(1, Lp)
    return pool, inv, mask


def binactive_pallas(x2d, row_scale=None, row_shift=None, out_dtype=jnp.bfloat16):
    """binFunc(x, binmat_mul=True) along the last dim of an (M, L) slab.

    Optionally fuses a per-row affine (BatchNorm scale/shift) applied *before*
    binarization.
    """
    x2d = jnp.asarray(x2d)
    if x2d.dtype not in (jnp.float32, jnp.bfloat16):
        x2d = x2d.astype(jnp.float32)
    M, L = x2d.shape
    # TODO(synk): binFunc's L <= 8 branch (signed mean, no abs) is not implemented.
    assert L > BIN_AGG, "binactive_pallas implements the last-dim > 8 path only"

    apply_affine = row_scale is not None
    if apply_affine:
        row_scale = jnp.asarray(row_scale, jnp.float32).reshape(M, 1)
        row_shift = jnp.asarray(row_shift, jnp.float32).reshape(M, 1)
    else:
        row_scale = jnp.ones((M, 1), jnp.float32)
        row_shift = jnp.zeros((M, 1), jnp.float32)

    TL = LANE
    Lp = _round_up(L, TL)
    NB = Lp // BIN_AGG
    lane_steps = Lp // TL

    # Row tiling: target >=4 total grid steps (pipelining + both TCs on v7x),
    # tiles capped at 512 rows, multiples of 16 (bf16 sublane packing).
    desired_rows = _cdiv(4, lane_steps)
    TM = max(16, min(512, _round_up(_cdiv(M, desired_rows), 16)))

    lanes_zero_padded = False
    if L < TL:                       # smaller than one lane tile: tiny pad
        x2d = jnp.pad(x2d, ((0, 0), (0, TL - L)))
        lanes_zero_padded = True
    if M < TM:                       # smaller than one row tile: tiny pad
        x2d = jnp.pad(x2d, ((0, TM - M), (0, 0)))
        row_scale = jnp.pad(row_scale, ((0, TM - M), (0, 0)))
        row_shift = jnp.pad(row_shift, ((0, TM - M), (0, 0)))
    Mp = max(M, TM)
    row_steps = _cdiv(Mp, TM)

    if Lp == L:
        apply_mask = False                       # no invalid lanes at all
    elif lanes_zero_padded:
        # padded lanes are exact zeros; only the fused shift could corrupt them
        apply_mask = apply_affine and (L % BIN_AGG != 0)
    else:
        apply_mask = True                        # ragged edge tile reads OOB

    pool_np, inv_np, mask_np = _bin_constants(L, Lp)
    pool = jnp.asarray(pool_np, jnp.bfloat16)        # (Lp, NB)  0/1
    bcast = jnp.asarray(pool_np.T, jnp.bfloat16)     # (NB, Lp)  0/1
    inv = jnp.asarray(inv_np, jnp.float32)           # (1, NB)
    mask = jnp.asarray(mask_np, jnp.float32)         # (1, Lp)

    kernel = partial(_binactive_kernel,
                     apply_affine=apply_affine, apply_mask=apply_mask)
    out = pl.pallas_call(
        kernel,
        out_shape=jax.ShapeDtypeStruct((Mp, Lp), out_dtype),
        grid=(row_steps, lane_steps),
        in_specs=[pl.BlockSpec((TM, TL), lambda i, j: (i, j)),
                  pl.BlockSpec((TM, 1), lambda i, j: (i, 0)),
                  pl.BlockSpec((TM, 1), lambda i, j: (i, 0)),
                  pl.BlockSpec((1, TL), lambda i, j: (0, j)),
                  pl.BlockSpec((TL, NB), lambda i, j: (j, 0)),
                  pl.BlockSpec((1, NB), lambda i, j: (0, 0)),
                  pl.BlockSpec((NB, TL), lambda i, j: (0, j))],
        out_specs=pl.BlockSpec((TM, TL), lambda i, j: (i, j)),
        compiler_params=pltpu.CompilerParams(
            dimension_semantics=("parallel", "parallel")),
    )(x2d, row_scale, row_shift, mask, pool, inv, bcast)
    return out[:M, :L]


def matmul_bias_relu_pallas(a, w, b, out_dtype=jnp.float32):
    """relu(a @ w + b); a:(M,K), w:(K,O), b:(O,). bf16 operands, f32 accumulate.

    K is left at its natural size (full-dim BlockSpec); only the tiny O dim is
    padded to 128 for lane-dense output stores.  Ragged M is handled by the
    cdiv grid (edge-tile OOB reads only contaminate discarded rows).
    """
    a = jnp.asarray(a)
    if a.dtype != jnp.bfloat16:
        a = a.astype(jnp.bfloat16)
    w = jnp.asarray(w)
    if w.dtype != jnp.bfloat16:
        w = w.astype(jnp.bfloat16)
    b = jnp.asarray(b, jnp.float32).reshape(1, -1)
    M, K = a.shape
    Kw, O = w.shape
    assert Kw == K
    Op = _round_up(O, 128)                           # lane-dense output
    w_p = jnp.pad(w, ((0, 0), (0, Op - O)))
    b_p = jnp.pad(b, ((0, 0), (0, Op - O)))

    if M <= 64:
        TM = _round_up(M, 16)
    else:
        row_steps = max(4, _cdiv(M, 512))            # >=4 grid steps, TM <= 512
        TM = min(512, _round_up(_cdiv(M, row_steps), 16))
    if M < TM:
        a = jnp.pad(a, ((0, TM - M), (0, 0)))
    Mp = max(M, TM)
    grid_m = _cdiv(Mp, TM)

    out = pl.pallas_call(
        _matmul_bias_relu_kernel,
        out_shape=jax.ShapeDtypeStruct((Mp, Op), out_dtype),
        grid=(grid_m,),
        in_specs=[pl.BlockSpec((TM, K), lambda i: (i, 0)),
                  pl.BlockSpec((K, Op), lambda i: (0, 0)),
                  pl.BlockSpec((1, Op), lambda i: (0, 0))],
        out_specs=pl.BlockSpec((TM, Op), lambda i: (i, 0)),
        compiler_params=pltpu.CompilerParams(dimension_semantics=("parallel",)),
    )(a, w_p, b_p)
    return out[:M, :O]


# --------------------------- im2col / col2im glue ---------------------------

def unfold_nchw(x, k, padding, stride=1, dilation=1):
    """torch Im2Col semantics: (N,C,H,W) -> (N, C*k*k, out_h*out_w)."""
    N, C, H, W = x.shape
    xp = jnp.pad(x, ((0, 0), (0, 0), (padding, padding), (padding, padding)))
    Hp, Wp = H + 2 * padding, W + 2 * padding
    out_h = (Hp - dilation * (k - 1) - 1) // stride + 1
    out_w = (Wp - dilation * (k - 1) - 1) // stride + 1
    patches = []
    for i in range(k):
        for j in range(k):
            sl = xp[:, :,
                    i * dilation: i * dilation + stride * (out_h - 1) + 1: stride,
                    j * dilation: j * dilation + stride * (out_w - 1) + 1: stride]
            patches.append(sl)                                   # (N, C, oh, ow)
    cols = jnp.stack(patches, axis=2)                            # (N, C, k*k, oh, ow)
    cols = cols.reshape(N, C * k * k, out_h * out_w)             # channel-major
    return cols, out_h, out_w


def unfold_rows(x, k, padding, stride=1, dilation=1):
    """im2col directly in matmul-row order: (N,C,H,W) -> (N*oh*ow, C*k*k)."""
    N, C, H, W = x.shape
    xp = jnp.pad(x, ((0, 0), (0, 0), (padding, padding), (padding, padding)))
    Hp, Wp = H + 2 * padding, W + 2 * padding
    out_h = (Hp - dilation * (k - 1) - 1) // stride + 1
    out_w = (Wp - dilation * (k - 1) - 1) // stride + 1
    patches = []
    for i in range(k):
        for j in range(k):
            sl = xp[:, :,
                    i * dilation: i * dilation + stride * (out_h - 1) + 1: stride,
                    j * dilation: j * dilation + stride * (out_w - 1) + 1: stride]
            patches.append(sl)                                   # (N, C, oh, ow)
    cols = jnp.stack(patches, axis=-1)                           # (N, C, oh, ow, k*k)
    cols = cols.transpose(0, 2, 3, 1, 4)                         # (N, oh, ow, C, k*k)
    return cols.reshape(N * out_h * out_w, C * k * k), out_h, out_w


def fold_nchw(cols, C, H, W, k, padding, stride=1, dilation=1):
    """torch Col2Im semantics: (N, C*k*k, L) -> (N, C, H, W) with overlap-add."""
    N = cols.shape[0]
    out_h = (H + 2 * padding - dilation * (k - 1) - 1) // stride + 1
    out_w = (W + 2 * padding - dilation * (k - 1) - 1) // stride + 1
    cols = cols.reshape(N, C, k, k, out_h, out_w)
    Hp, Wp = H + 2 * padding, W + 2 * padding
    out = jnp.zeros((N, C, Hp, Wp), jnp.float32)     # f32 overlap-add (small)
    for i in range(k):
        for j in range(k):
            out = out.at[:, :,
                         i * dilation: i * dilation + stride * (out_h - 1) + 1: stride,
                         j * dilation: j * dilation + stride * (out_w - 1) + 1: stride
                         ].add(cols[:, :, i, j].astype(jnp.float32))
    return out[:, :, padding: padding + H, padding: padding + W]


# ---------------------------- jitted forward paths ---------------------------

@partial(jax.jit, static_argnames=("kernel_size", "dilation", "padding", "stride",
                                   "conv_stride", "conv_padding"))
def _hbpass_conv_forward(x, conv_w, conv_b, bn_gamma, bn_beta, *, kernel_size,
                         dilation, padding, stride, conv_stride, conv_padding):
    x = jnp.asarray(x, jnp.float32)
    N, C, H, W = x.shape

    # --- BatchNorm2d stats (training mode: batch stats, biased var, eps=1e-4) ---
    mean = jnp.mean(x, axis=(0, 2, 3))
    var = jnp.mean((x - mean.reshape(1, -1, 1, 1)) ** 2, axis=(0, 2, 3))
    scale_c = bn_gamma / jnp.sqrt(var + 1e-4)
    shift_c = bn_beta - mean * scale_c

    kk = kernel_size * kernel_size
    if padding == 0:
        # No im2col zero-padding -> BN commutes with the unfold gather, so fuse
        # the BN affine into the binactive kernel (one fewer HBM pass).
        src = x.astype(jnp.bfloat16)
        row_scale = jnp.broadcast_to(
            scale_c[None, :, None], (N, C, kk)).reshape(N * C * kk, 1)
        row_shift = jnp.broadcast_to(
            shift_c[None, :, None], (N, C, kk)).reshape(N * C * kk, 1)
    else:
        # Zero-padding inserted by im2col must stay zero *after* BN.
        src = (x * scale_c.reshape(1, -1, 1, 1)
               + shift_c.reshape(1, -1, 1, 1)).astype(jnp.bfloat16)
        row_scale = None
        row_shift = None

    # --- im2col (forward-arg params) -> binactive -> col2im ---
    cols, _, _ = unfold_nchw(src, kernel_size, padding, stride, dilation)
    _, Kc, L = cols.shape
    binned = binactive_pallas(cols.reshape(N * Kc, L), row_scale, row_shift,
                              out_dtype=jnp.bfloat16)
    binned = binned.reshape(N, Kc, L)
    img = fold_nchw(binned, C, H, W, kernel_size, padding, stride, dilation)
    img = img.astype(jnp.bfloat16)

    # --- FPconv (constructor params) as im2col matmul + bias + ReLU ---
    # TODO(synk): the second im2col is still materialized by XLA; fusing the k*k
    # window gather into the matmul kernel (gather index_map / manual DMA) would
    # remove one more pass over the 9x-expanded slab.
    O, Cc, kh, kw = conv_w.shape
    A, oh2, ow2 = unfold_rows(img, kh, conv_padding, conv_stride, 1)
    Wt = conv_w.reshape(O, Cc * kh * kw).T
    out = matmul_bias_relu_pallas(A, Wt, conv_b)
    return out.reshape(N, oh2, ow2, O).transpose(0, 3, 1, 2)     # back to NCHW


@partial(jax.jit, static_argnames=("previous_conv", "input_channels"))
def _hbpass_linear_forward(x, lin_w, lin_b, *, previous_conv, input_channels):
    orig_shape = x.shape
    x2 = x.reshape(x.shape[0], -1) if x.ndim == 4 else x
    binned = binactive_pallas(x2, out_dtype=jnp.bfloat16)
    if x.ndim == 4:
        binned = binned.reshape(orig_shape)
    if previous_conv:
        binned = binned.reshape(binned.shape[0], input_channels)
    else:
        binned = binned.reshape(x2.shape)
    return matmul_bias_relu_pallas(binned, lin_w.T, lin_b)


# ------------------------------- module port --------------------------------

class HbPassPallas:
    """JAX/Pallas port of hbPass's forward pass (synthetic deterministic init)."""

    def __init__(self, input_channels, output_channels, key, previous_conv=False,
                 kernel_size=-1, stride=-1, padding=-1, dropout=0, groups=1,
                 Linear=False):
        self.input_channels = input_channels
        self.output_channels = output_channels
        self.kernel_size = kernel_size
        self.stride = stride
        self.padding = padding
        self.Linear = Linear
        self.previous_conv = previous_conv
        self.dropout_ratio = dropout
        # TODO(synk): training-mode nn.Dropout (RNG mask) not implemented; example uses dropout=0.
        assert dropout == 0
        if Linear:
            k1, k2 = jax.random.split(key)
            self.lin_w = 0.1 * jax.random.normal(
                k1, (output_channels, input_channels), jnp.float32)
            self.lin_b = 0.1 * jax.random.normal(k2, (output_channels,), jnp.float32)
        else:
            # TODO(synk): grouped conv (groups > 1) not implemented.
            assert groups == 1
            k1, k2, k3, k4 = jax.random.split(key, 4)
            self.conv_w = 0.1 * jax.random.normal(
                k1, (output_channels, input_channels, kernel_size, kernel_size),
                jnp.float32)
            self.conv_b = 0.1 * jax.random.normal(k2, (output_channels,), jnp.float32)
            self.bn_gamma = 1.0 + 0.1 * jax.random.normal(k3, (input_channels,), jnp.float32)
            self.bn_beta = 0.1 * jax.random.normal(k4, (input_channels,), jnp.float32)

    def __call__(self, x, kernel_size=3, dilation=1, padding=0, stride=1):
        if self.Linear:
            return _hbpass_linear_forward(
                x, self.lin_w, self.lin_b,
                previous_conv=self.previous_conv,
                input_channels=self.input_channels)
        return _hbpass_conv_forward(
            x, self.conv_w, self.conv_b, self.bn_gamma, self.bn_beta,
            kernel_size=kernel_size, dilation=dilation, padding=padding,
            stride=stride, conv_stride=self.stride, conv_padding=self.padding)


# ------------------------------ reference utils ------------------------------

def _binactive_ref_np(x2d):
    x = np.asarray(x2d, np.float64)
    M, L = x.shape
    out = np.zeros_like(x)
    for start in range(0, L, BIN_AGG):
        end = min(start + BIN_AGG, L)
        m = np.mean(np.abs(x[:, start:end]), axis=-1, keepdims=True)
        out[:, start:end] = m * np.sign(x[:, start:end])
    return out


if __name__ == "__main__":
    key = jax.random.PRNGKey(0)
    kx, kconv, klin, kxl, kchk = jax.random.split(key, 5)

    # ----- conv path: hbPass(4, 8, kernel_size=3, stride=1, padding=1) -----
    x = jax.random.normal(kx, (2, 4, 16, 16), jnp.float32)          # NCHW
    conv_mod = HbPassPallas(4, 8, kconv, kernel_size=3, stride=1, padding=1)
    y = jax.block_until_ready(conv_mod(x))
    assert y.shape == (2, 8, 16, 16)
    assert bool(jnp.all(jnp.isfinite(y)))

    # ----- linear path: hbPass(32, 16, Linear=True) -----
    xl = jax.random.normal(kxl, (2, 32), jnp.float32)
    lin_mod = HbPassPallas(32, 16, klin, Linear=True)
    yl = jax.block_until_ready(lin_mod(xl))
    assert yl.shape == (2, 16)
    assert bool(jnp.all(jnp.isfinite(yl)))

    # ----- sanity checks of the two kernels against simple references -----
    xt = jax.random.normal(kchk, (24, 196), jnp.float32)
    got = np.asarray(
        jax.block_until_ready(binactive_pallas(xt)).astype(jnp.float32))
    ref = _binactive_ref_np(np.asarray(xt))
    # bf16 pooling operands / bf16 output -> slightly looser tolerance than f32.
    assert np.allclose(got, ref, rtol=2e-2, atol=2e-2)

    A = jax.random.normal(kchk, (64, 36), jnp.float32)
    W = 0.1 * jax.random.normal(kx, (36, 8), jnp.float32)
    b = 0.1 * jax.random.normal(kxl, (8,), jnp.float32)
    got_mm = np.asarray(jax.block_until_ready(matmul_bias_relu_pallas(A, W, b)))
    ref_mm = np.maximum(np.asarray(A) @ np.asarray(W) + np.asarray(b), 0.0)
    # bf16 operands (full-rate MXU) -> slightly looser tolerance than f32.
    assert np.allclose(got_mm, ref_mm, rtol=2e-2, atol=2e-2)

    print("KERNEL_OK")
</pallas_src>

<mosaic_0001>
module attributes {stable_mosaic.version = 11 : i64} {
  func.func @_binactive_kernel(%arg0: i32, %arg1: i32, %arg2: memref<48x128xbf16, #tpu.memory_space<vmem>>, %arg3: memref<48x1xf32, #tpu.memory_space<vmem>>, %arg4: memref<48x1xf32, #tpu.memory_space<vmem>>, %arg5: memref<1x128xf32, #tpu.memory_space<vmem>>, %arg6: memref<128x32xbf16, #tpu.memory_space<vmem>>, %arg7: memref<1x32xf32, #tpu.memory_space<vmem>>, %arg8: memref<32x128xbf16, #tpu.memory_space<vmem>>, %arg9: memref<48x128xbf16, #tpu.memory_space<vmem>>) attributes {dimension_semantics = [#tpu.dimension_semantics<parallel>, #tpu.dimension_semantics<parallel>], iteration_bounds = array<i64: 2, 2>, scalar_prefetch = 0 : i64, scratch_operands = 0 : i64, tpu.core_type = #tpu.core_type<tc>, window_params = [{transform_indices = @transform_0, window_bounds = array<i64: 48, 128>}, {transform_indices = @transform_1, window_bounds = array<i64: 48, 1>}, {transform_indices = @transform_2, window_bounds = array<i64: 48, 1>}, {transform_indices = @transform_3, window_bounds = array<i64: 1, 128>}, {transform_indices = @transform_4, window_bounds = array<i64: 128, 32>}, {pipeline_mode = #tpu.pipeline_mode<synchronous>, transform_indices = @transform_5, window_bounds = array<i64: 1, 32>}, {transform_indices = @transform_6, window_bounds = array<i64: 32, 128>}, {transform_indices = @transform_7, window_bounds = array<i64: 48, 128>}]} {
    %c0 = arith.constant 0 : index
    %c0_0 = arith.constant 0 : index
    %0 = vector.load %arg2[%c0, %c0_0] : memref<48x128xbf16, #tpu.memory_space<vmem>>, vector<48x128xbf16>
    %1 = arith.extf %0 : vector<48x128xbf16> to vector<48x128xf32>
    %c0_1 = arith.constant 0 : index
    %c0_2 = arith.constant 0 : index
    %2 = vector.load %arg3[%c0_1, %c0_2] : memref<48x1xf32, #tpu.memory_space<vmem>>, vector<48x1xf32>
    %3 = vector.broadcast %2 : vector<48x1xf32> to vector<48x128xf32>
    %4 = arith.mulf %1, %3 : vector<48x128xf32>
    %c0_3 = arith.constant 0 : index
    %c0_4 = arith.constant 0 : index
    %5 = vector.load %arg4[%c0_3, %c0_4] : memref<48x1xf32, #tpu.memory_space<vmem>>, vector<48x1xf32>
    %6 = vector.broadcast %5 : vector<48x1xf32> to vector<48x128xf32>
    %7 = arith.addf %4, %6 : vector<48x128xf32>
    %c0_5 = arith.constant 0 : index
    %c0_6 = arith.constant 0 : index
    %8 = vector.load %arg5[%c0_5, %c0_6] : memref<1x128xf32, #tpu.memory_space<vmem>>, vector<1x128xf32>
    %cst = arith.constant 0.000000e+00 : f32
    %9 = vector.broadcast %cst : f32 to vector<1x128xf32>
    %10 = arith.cmpf ogt, %8, %9 : vector<1x128xf32>
    %cst_7 = arith.constant 0.000000e+00 : f32
    %11 = vector.shape_cast %10 : vector<1x128xi1> to vector<1x128xi1>
    %12 = vector.broadcast %11 : vector<1x128xi1> to vector<48x128xi1>
    %13 = vector.broadcast %cst_7 : f32 to vector<48x128xf32>
    %14 = arith.select %12, %7, %13 : vector<48x128xi1>, vector<48x128xf32>
    %15 = math.absf %14 : vector<48x128xf32>
    %16 = arith.truncf %15 : vector<48x128xf32> to vector<48x128xbf16>
    %c0_8 = arith.constant 0 : index
    %c0_9 = arith.constant 0 : index
    %17 = vector.load %arg6[%c0_8, %c0_9] : memref<128x32xbf16, #tpu.memory_space<vmem>>, vector<128x32xbf16>
    %cst_10 = arith.constant dense<0.000000e+00> : vector<48x32xf32>
    %18 = tpu.matmul %16, %17, %cst_10 {dimension_numbers = #tpu.dot_dimension_numbers<[1], [0], [0], [1], [0, 0, 1, 1], [], []>} : vector<48x128xbf16>, vector<128x32xbf16>, vector<48x32xf32> -> vector<48x32xf32>
    %c0_11 = arith.constant 0 : index
    %c0_12 = arith.constant 0 : index
    %19 = vector.load %arg7[%c0_11, %c0_12] : memref<1x32xf32, #tpu.memory_space<vmem>>, vector<1x32xf32>
    %20 = vector.broadcast %19 : vector<1x32xf32> to vector<48x32xf32>
    %21 = arith.mulf %18, %20 : vector<48x32xf32>
    %22 = arith.truncf %21 : vector<48x32xf32> to vector<48x32xbf16>
    %c0_13 = arith.constant 0 : index
    %c0_14 = arith.constant 0 : index
    %23 = vector.load %arg8[%c0_13, %c0_14] : memref<32x128xbf16, #tpu.memory_space<vmem>>, vector<32x128xbf16>
    %cst_15 = arith.constant dense<0.000000e+00> : vector<48x128xf32>
    %24 = tpu.matmul %22, %23, %cst_15 {dimension_numbers = #tpu.dot_dimension_numbers<[1], [0], [0], [1], [0, 0, 1, 1], [], []>} : vector<48x32xbf16>, vector<32x128xbf16>, vector<48x128xf32> -> vector<48x128xf32>
    %cst_16 = arith.constant 0.000000e+00 : f32
    %25 = vector.broadcast %cst_16 : f32 to vector<48x128xf32>
    %26 = arith.cmpf ogt, %14, %25 : vector<48x128xf32>
    %cst_17 = arith.constant 0.000000e+00 : f32
    %27 = vector.broadcast %cst_17 : f32 to vector<48x128xf32>
    %28 = arith.cmpf olt, %14, %27 : vector<48x128xf32>
    %cst_18 = arith.constant 0.000000e+00 : f32
    %29 = vector.broadcast %cst_18 : f32 to vector<48x128xf32>
    %30 = arith.subf %29, %24 : vector<48x128xf32>
    %cst_19 = arith.constant 0.000000e+00 : f32
    %31 = vector.broadcast %cst_19 : f32 to vector<48x128xf32>
    %32 = arith.select %28, %30, %31 : vector<48x128xi1>, vector<48x128xf32>
    %33 = arith.select %26, %24, %32 : vector<48x128xi1>, vector<48x128xf32>
    %34 = arith.truncf %33 : vector<48x128xf32> to vector<48x128xbf16>
    %c0_20 = arith.constant 0 : index
    %c0_21 = arith.constant 0 : index
    %35 = vector.load %arg9[%c0_20, %c0_21] : memref<48x128xbf16, #tpu.memory_space<vmem>>, vector<48x128xbf16>
    tpu.vector_store %arg9[%c0_20, %c0_21], %34 {strides = array<i32>} : memref<48x128xbf16, #tpu.memory_space<vmem>>, vector<48x128xbf16>,
    return
  }
  func.func @transform_0(%arg0: i32, %arg1: i32) -> (i32, i32) {
    %c0_i32 = arith.constant 0 : i32
    return %arg0, %arg1 : i32, i32
  }
  func.func @transform_1(%arg0: i32, %arg1: i32) -> (i32, i32) {
    %c0_i32 = arith.constant 0 : i32
    %c0_i32_0 = arith.constant 0 : i32
    return %arg0, %c0_i32 : i32, i32
  }
  func.func @transform_2(%arg0: i32, %arg1: i32) -> (i32, i32) {
    %c0_i32 = arith.constant 0 : i32
    %c0_i32_0 = arith.constant 0 : i32
    return %arg0, %c0_i32 : i32, i32
  }
  func.func @transform_3(%arg0: i32, %arg1: i32) -> (i32, i32) {
    %c0_i32 = arith.constant 0 : i32
    %c0_i32_0 = arith.constant 0 : i32
    return %c0_i32, %arg1 : i32, i32
  }
  func.func @transform_4(%arg0: i32, %arg1: i32) -> (i32, i32) {
    %c0_i32 = arith.constant 0 : i32
    %c0_i32_0 = arith.constant 0 : i32
    return %arg1, %c0_i32 : i32, i32
  }
  func.func @transform_5(%arg0: i32, %arg1: i32) -> (i32, i32) {
    %c0_i32 = arith.constant 0 : i32
    %c0_i32_0 = arith.constant 0 : i32
    %c0_i32_1 = arith.constant 0 : i32
    return %c0_i32, %c0_i32_0 : i32, i32
  }
  func.func @transform_6(%arg0: i32, %arg1: i32) -> (i32, i32) {
    %c0_i32 = arith.constant 0 : i32
    %c0_i32_0 = arith.constant 0 : i32
    return %c0_i32, %arg1 : i32, i32
  }
  func.func @transform_7(%arg0: i32, %arg1: i32) -> (i32, i32) {
    %c0_i32 = arith.constant 0 : i32
    return %arg0, %arg1 : i32, i32
  }
}

module attributes {stable_mosaic.version = 11 : i64} {
  func.func @_matmul_bias_relu_kernel(%arg0: i32, %arg1: memref<128x36xbf16, #tpu.memory_space<vmem>>, %arg2: memref<36x128xbf16, #tpu.memory_space<vmem>>, %arg3: memref<1x128xf32, #tpu.memory_space<vmem>>, %arg4: memref<128x128xf32, #tpu.memory_space<vmem>>) attributes {dimension_semantics = [#tpu.dimension_semantics<parallel>], iteration_bounds = array<i64: 4>, scalar_prefetch = 0 : i64, scratch_operands = 0 : i64, tpu.core_type = #tpu.core_type<tc>, window_params = [{transform_indices = @transform_0, window_bounds = array<i64: 128, 36>}, {pipeline_mode = #tpu.pipeline_mode<synchronous>, transform_indices = @transform_1, window_bounds = array<i64: 36, 128>}, {pipeline_mode = #tpu.pipeline_mode<synchronous>, transform_indices = @transform_2, window_bounds = array<i64: 1, 128>}, {transform_indices = @transform_3, window_bounds = array<i64: 128, 128>}]} {
    %c0 = arith.constant 0 : index
    %c0_0 = arith.constant 0 : index
    %0 = vector.load %arg1[%c0, %c0_0] : memref<128x36xbf16, #tpu.memory_space<vmem>>, vector<128x36xbf16>
    %c0_1 = arith.constant 0 : index
    %c0_2 = arith.constant 0 : index
    %1 = vector.load %arg2[%c0_1, %c0_2] : memref<36x128xbf16, #tpu.memory_space<vmem>>, vector<36x128xbf16>
    %cst = arith.constant dense<0.000000e+00> : vector<128x128xf32>
    %2 = tpu.matmul %0, %1, %cst {dimension_numbers = #tpu.dot_dimension_numbers<[1], [0], [0], [1], [0, 0, 1, 1], [], []>} : vector<128x36xbf16>, vector<36x128xbf16>, vector<128x128xf32> -> vector<128x128xf32>
    %c0_3 = arith.constant 0 : index
    %c0_4 = arith.constant 0 : index
    %3 = vector.load %arg3[%c0_3, %c0_4] : memref<1x128xf32, #tpu.memory_space<vmem>>, vector<1x128xf32>
    %4 = vector.broadcast %3 : vector<1x128xf32> to vector<128x128xf32>
    %5 = arith.addf %2, %4 : vector<128x128xf32>
    %cst_5 = arith.constant 0.000000e+00 : f32
    %6 = vector.broadcast %cst_5 : f32 to vector<128x128xf32>
    %7 = arith.maximumf %5, %6 : vector<128x128xf32>
    %c0_6 = arith.constant 0 : index
    %c0_7 = arith.constant 0 : index
    %8 = vector.load %arg4[%c0_6, %c0_7] : memref<128x128xf32, #tpu.memory_space<vmem>>, vector<128x128xf32>
    tpu.vector_store %arg4[%c0_6, %c0_7], %7 {strides = array<i32>} : memref<128x128xf32, #tpu.memory_space<vmem>>, vector<128x128xf32>,
    return
  }
  func.func @transform_0(%arg0: i32) -> (i32, i32) {
    %c0_i32 = arith.constant 0 : i32
    %c0_i32_0 = arith.constant 0 : i32
    return %arg0, %c0_i32 : i32, i32
  }
  func.func @transform_1(%arg0: i32) -> (i32, i32) {
    %c0_i32 = arith.constant 0 : i32
    %c0_i32_0 = arith.constant 0 : i32
    %c0_i32_1 = arith.constant 0 : i32
    return %c0_i32, %c0_i32_0 : i32, i32
  }
  func.func @transform_2(%arg0: i32) -> (i32, i32) {
    %c0_i32 = arith.constant 0 : i32
    %c0_i32_0 = arith.constant 0 : i32
    %c0_i32_1 = arith.constant 0 : i32
    return %c0_i32, %c0_i32_0 : i32, i32
  }
  func.func @transform_3(%arg0: i32) -> (i32, i32) {
    %c0_i32 = arith.constant 0 : i32
    %c0_i32_0 = arith.constant 0 : i32
    return %arg0, %c0_i32 : i32, i32
  }
}

</mosaic_0001>

<bundles_post_ra>
// kernel: _hbpass_conv_forward.2
= control target key start
LH: loop header
LB: loop body
LE: loop exit
PB: predicated region body
PF: predicated region fallthrough
CT: control target
= control target key end

     0   :  { %s2234_s0 = inlined_call_operand.vmem [shape: bf16[72,196], index: 0, kind: input, shape index: {}]   ;;  %s2235_s1 = inlined_call_operand.vmem [shape: f32[72,1], index: 1, kind: input, shape index: {}]   ;;  %s2236_s2 = inlined_call_operand.vmem [shape: f32[72,1], index: 2, kind: input, shape index: {}]   ;;  %s2237_s3 = inlined_call_operand.vmem [shape: f32[1,256], index: 3, kind: input, shape index: {}]   ;;  %s2238_s4 = inlined_call_operand.vmem [shape: bf16[256,32], index: 4, kind: input, shape index: {}]   ;;  %s2239_s5 = inlined_call_operand.vmem [shape: f32[1,32], index: 5, kind: input, shape index: {}]   ;;  %s2240_s6 = inlined_call_operand.vmem [shape: bf16[32,256], index: 6, kind: input, shape index: {}]   ;;  %s2241_s7 = inlined_call_operand.vmem [shape: bf16[72,256], index: 7, kind: output, shape index: {}]  }
   0x1   :  { %2246 = sst [smem:[#allocation11_spill]] %s2234_s0 }
   0x2   :  { %s1910_s24 = smov 0   ;;  %s1912_s25 = smov 0  }
   0x3   :  { %s1914_s26 = smov 0   ;;  %s1916_s27 = smov 0  }
   0x4   :  { %s1918_s28 = smov 0   ;;  %s1920_s29 = smov 0  }
   0x5   :  { %s1922_s30 = smov 0   ;;  %s1924_s8 = smov 0  }
   0x6   :  { %s1926_s9 = smov 0  }
   0x7 LB: > { %2247 = sst [smem:[#allocation5_spill]] %s1783_s27  ;;  %s1310_s10 = sadd.s32 4294967295, %s1803_s9   ;;  %s1803_s9 = sphi %s1926_s9, %s17_s9   ;;  %s1799_s8 = sphi %s1924_s8, %s2270_s8   ;;  %s1795_s30 = sphi %s1922_s30, %s2274_s30   ;;  %s1791_s29 = sphi %s1920_s29, %s2268_s29   ;;  %s1787_s28 = sphi %s1918_s28, %s2273_s28   ;;  %s1783_s27 = sphi %s1916_s27, %s2267_s27   ;;  %s1779_s26 = sphi %s1914_s26, %s2266_s26   ;;  %s1775_s25 = sphi %s1912_s25, %s2272_s25   ;;  %s1771_s24 = sphi %s1910_s24, %s2271_s24  }
   0x8   : > { %2248 = sst [smem:[#allocation6_spill]] %s1799_s8  ;;  %s26_s11 = sadd.s32 1, %s1795_s30 }
   0x9   : > { %p27_p0 = scmp.ge.s32.totalorder %s26_s11, 2  ;;  %s29_s12 = sadd.s32 1, %s1799_s8 }
   0xa   : > { %s38_s13 = sadd.s32 1, %s1783_s27  ;;  %p45_p1 = scmp.ne.s32.totalorder %s1783_s27, %s1779_s26 }
   0xb   : > { %s2276_s11 = smov (%p27_p0, %s26_s11), 0  ;;  %s2278_s12 = smov (!%p27_p0, %s29_s12), %s1799_s8 }
   0xc   : > { %2249 = sst [smem:[#allocation7_spill]] %s2276_s11  ;;  %s34_s14 = ssub.s32 %s1795_s30, %s2276_s11 }
   0xd   : > { %p46_p2 = scmp.eq.s32.totalorder %s1803_s9, 0  ;;  %p31_p3 = scmp.ge.s32.totalorder %s2278_s12, 2 }
   0xe   : > { %p187_p4 = scmp.eq.s32.totalorder %s34_s14, 0  ;;  %s189_s16 = sadd.s32 1, %s1775_s25 }
   0xf   : > { %p1970_p5 = por %p46_p2, %p45_p1  ;;  %s2280_s12 = smov (%p31_p3, %s2278_s12), 0 }
  0x10   : > { %2251 = sst [smem:[#allocation8_spill]] %s2280_s12  ;;  %s33_s18 = ssub.s32 %s1799_s8, %s2280_s12 }
  0x11   : > { %s1978_s17 = scalar_select %p187_p4, %s1775_s25, %s189_s16  }
  0x12   : > { %p196_p6 = scmp.ne.s32.totalorder %s1775_s25, %s1771_s24  ;;  %s35_s19 = sor.u32 %s34_s14, %s33_s18 }
  0x13   : > { %2252 = sst [smem:[#allocation9_spill]] %s1978_s17  ;;  %p228_p7 = scmp.eq.s32.totalorder %s1310_s10, 3 }
  0x14   : > { %p36_p8 = scmp.eq.s32.totalorder %s35_s19, 0  ;;  %p1984_p9 = por %p196_p6, %p46_p2 }
  0x15   : > { %p1991_p10 = por %p228_p7, %p45_p1  ;;  %p1313_p11 = scmp.ge.s32.totalorder %s1803_s9, 4 }
  0x16   : > { %s1996_s22 = scalar_select %p36_p8, %s1783_s27, %s38_s13  }
  0x17   : > { %253 = sbr.rel (%p1313_p11) target bundleno = 100 (0x64), region = 20 }
  0x18   : > { %2255 = sst [smem:[#allocation10_spill]] %s1996_s22 }
  0x1c   : > { %256 = sbr.rel (!%p1970_p5) target bundleno = 92 (0x5c), region = 24  ;;  %s258_s23 = sand.u32 (%p1970_p5), 1, %s1783_s27  }
  0x1d   : > { %s261_s10 = smul.u32 (%p1970_p5), 6, %s1799_s8  ;;  %s2256_s0 = sld [smem:[#allocation11_spill]] (%p1970_p5) }
  0x1e   : > { %s1448_s14 = smul.u32 (%p1970_p5), 24, %s258_s23 }
  0x1f   : > { %s262_s16 = ssub.s32 (%p1970_p5), 9, %s261_s10  ;;  %s1389_s18 = smul.u32 (%p1970_p5), 12, %s1799_s8 }
  0x20   : > { %p263_p12 = scmp.lt.s32.totalorder (%p1970_p5), %s262_s16, 6  ;;  %s2013_s17 = scalar_lea.vmem (%p1970_p5), [#allocation2], %s1448_s14  }
  0x21   : > { %s268_s19 = sadd.s32 %s1795_s30, %s1389_s18 }
  0x22   : > { %s2282_s16 = smov (!%p263_p12, %s262_s16), 6  ;;  %s1317_s13 = sshll.u32 %s268_s19, 2 }
  0x23   : > { %s1314_s12 = sshll.u32 %s2282_s16, 2  ;;  %s2011_s15 = scalar_lea.vmem %s2256_s0, %s1317_s13  }
  0x24   : > { %p1318_p13 = scmp.eq.s32.totalorder %s1314_s12, 0 }
  0x25   : > { %1653 = sdivrem.u32 (!%p1318_p13), %s2282_s16, 6 }
  0x26   : > { %273 = sbr.rel (%p1318_p13) target bundleno = 92 (0x5c), region = 28 }
  0x2e   : > { %s2016_s23 = spop.drf %1653 }
  0x2f   : > { %s1655_s10 = spop.drf %1653  ;;  %p1319_p0 = scmp.le.s32.totalorder %s2016_s23, 0 }
  0x30   : > { %s2257_s18 = smov (!%p1319_p0), %s2013_s17  ;;  %s2258_s11 = smov (!%p1319_p0), %s2011_s15 }
  0x31   : > { %1197 = sbr.rel (%p1319_p0) target bundleno = 66 (0x42), region = 250  ;;  %s2025_s22 = smov (!%p1319_p0), 0  }
  0x32   : > { %s2027_s14 = smov (!%p1319_p0), 0  }
  0x36 LB: >> { %v291_v0 = vld [vmem:[%s1811_s11] sm:$0xf]  ;;  %v293_v1 = vld [vmem:[%s1811_s11 + $0x8] sm:$0xf]  ;;  %v295_v2 = vld [vmem:[%s1811_s11 + $0x10] sm:$0xf]  ;;  %s1819_s14 = sphi %s2027_s14, %s285_s14   ;;  %s1815_s22 = sphi %s2025_s22, %s2259_s22   ;;  %s1811_s11 = sphi %s2258_s11, %s308_s11   ;;  %s1807_s18 = sphi %s2257_s18, %s309_s18  }
  0x37   : >> { %292 = vst [vmem:[%s1807_s18] sm:$0xf] %v291_v0  ;;  %v297_v3 = vld [vmem:[%s1811_s11 + $0x18] sm:$0xf]  ;;  %s303_s12 = sadd.s32 1, %s1815_s22  ;;  %v299_v4 = vld [vmem:[%s1811_s11 + $0x20] sm:$0xf] }
  0x38   : >> { %294 = vst [vmem:[%s1807_s18 + $0x4] sm:$0xf] %v293_v1  ;;  %p304_p1 = scmp.ge.s32.totalorder %s303_s12, %s2016_s23  ;;  %v301_v5 = vld [vmem:[%s1811_s11 + $0x28] sm:$0xf]  ;;  %s285_s14 = sadd.s32 1, %s1819_s14  }
  0x39   : >> { %296 = vst [vmem:[%s1807_s18 + $0x8] sm:$0xf] %v295_v2  ;;  %p284_p2 = scmp.ge.s32.totalorder %s285_s14, %s2016_s23 }
  0x3a   : >> { %298 = vst [vmem:[%s1807_s18 + $0xc] sm:$0xf] %v297_v3  ;;  %s2284_s12 = smov (%p304_p1, %s303_s12), 0 }
  0x3b   : >> { %300 = vst [vmem:[%s1807_s18 + $0x10] sm:$0xf] %v299_v4  ;;  %s306_s19 = smul.u32 48, %s2284_s12  ;;  %s2259_s22 = smov %s2284_s12 }
  0x3c   : >> { %302 = vst [vmem:[%s1807_s18 + $0x14] sm:$0xf] %v301_v5  ;;  %s307_s13 = smul.u32 24, %s2284_s12 }
  0x3d   : >> { %s308_s11 = scalar_lea.vmem %s2011_s15, %s306_s19   ;;  %287 = sbr.rel (!%p284_p2) target bundleno = 54 (0x36), region = 256 }
  0x3e   : >> { %s309_s18 = scalar_lea.vmem %s2013_s17, %s307_s13 [#allocation2]  }
  0x42 PF: > { %1656 = sdivrem.u32 %s2282_s16, 6 }
  0x43   : > { %s1320_s10 = smul.u32 48, %s2016_s23 }
  0x44   : > { %s1321_s19 = smul.u32 24, %s2016_s23 }
  0x45   : > { %s2049_s13 = scalar_lea.vmem %s2011_s15, %s1320_s10  }
  0x46   : > { %s2052_s0 = scalar_lea.vmem %s2013_s17, %s1321_s19 [#allocation2]  }
  0x4b   : > { %s1657_s8 = spop.drf %1656 }
  0x4c   : > { %s1658_s27 = spop.drf %1656 }
  0x4d   : > { %p1322_p3 = scmp.le.s32.totalorder %s1658_s27, 0 }
  0x4e   : > { %s1821_s14 = smov (!%p1322_p3), %s2052_s0   ;;  %s1825_s18 = smov (!%p1322_p3), %s2049_s13  }
  0x4f   : > { %1211 = sbr.rel (%p1322_p3) target bundleno = 92 (0x5c), region = 261  ;;  %s1829_s11 = smov (!%p1322_p3), 0  }
  0x50   : > { %s1833_s22 = smov (!%p1322_p3), 0  }
  0x54 LB: >> { %v326_v6 = vld [vmem:[%s1827_s18] sm:$0xf]  ;;  %s328_s17 = sadd.s32 1, %s1831_s11  ;;  %s320_s22 = sadd.s32 1, %s1835_s22   ;;  %s1835_s22 = sphi %s1833_s22, %s320_s22   ;;  %s1831_s11 = sphi %s1829_s11, %s1830_s11   ;;  %s1827_s18 = sphi %s1825_s18, %s333_s18   ;;  %s1823_s14 = sphi %s1821_s14, %s334_s14  }
  0x55   : >> { %327 = vst [vmem:[%s1823_s14] sm:$0xf] %v326_v6  ;;  %p329_p4 = scmp.ge.s32.totalorder %s328_s17, %s1658_s27  ;;  %p319_p5 = scmp.ge.s32.totalorder %s320_s22, %s1658_s27 }
  0x57   : >> { %s2286_s17 = smov (%p329_p4, %s328_s17), 0  ;;  %322 = sbr.rel (!%p319_p5) target bundleno = 84 (0x54), region = 267 }
  0x58   : >> { %s1323_s8 = sshll.u32 %s2286_s17, 3  ;;  %s1324_s16 = sshll.u32 %s2286_s17, 2 }
  0x59   : >> { %s333_s18 = scalar_lea.vmem %s2049_s13, %s1323_s8   ;;  %s334_s14 = scalar_lea.vmem %s2052_s0, %s1324_s16 [#allocation2]  }
  0x5a   : >> { %s1830_s11 = smov %s2286_s17  }
  0x5c PF: > { %446 = sbr.rel (!%p1984_p9) target bundleno = 100 (0x64), region = 88  ;;  %s448_s15 = sand.u32 (%p1984_p9), 1, %s1775_s25  }
  0x5d   : > { %s1326_s23 = sshll.u32 (%p1984_p9), %s1795_s30, 2  ;;  %s1325_s12 = sshll.u32 (%p1984_p9), %s448_s15, 4 }
  0x5e   : > { %s452_s11 = scalar_lea.vmem (%p1984_p9), %s2240_s6, %s1326_s23  ;;  %s450_s14 = scalar_lea.vmem (%p1984_p9), [#allocation3], %s1325_s12 }
  0x5f   : > { %v469_v7 = vld [vmem:[%s452_s11] sm:$0xf] (%p1984_p9)  ;;  %v471_v8 = vld [vmem:[%s452_s11 + $0x8] sm:$0xf] (%p1984_p9)  ;;  %v473_v9 = vld [vmem:[%s452_s11 + $0x10] sm:$0xf] (%p1984_p9) }
  0x60   : > { %470 = vst [vmem:[%s450_s14] sm:$0xf] (%p1984_p9), %v469_v7  ;;  %v475_v10 = vld [vmem:[%s452_s11 + $0x18] sm:$0xf] (%p1984_p9) }
  0x61   : > { %472 = vst [vmem:[%s450_s14 + $0x4] sm:$0xf] %v471_v8 }
  0x62   : > { %474 = vst [vmem:[%s450_s14 + $0x8] sm:$0xf] %v473_v9 }
  0x63   : > { %476 = vst [vmem:[%s450_s14 + $0xc] sm:$0xf] %v475_v10 }
  0x64 PF: > { %p1327_p6 = scmp.ge.s32.totalorder %s1803_s9, 1  ;;  %p507_p7 = scmp.lt.s32.totalorder %s1803_s9, 5 }
  0x66   : > { %p508_p8 = pnand %p1327_p6, %p507_p7 }
  0x67   : > { %s2068_s0 = smul.u32 (!%p508_p8), 6, %s1791_s29  ;;  %s1331_s15 = sshll.u32 (!%p508_p8), %s1787_s28, 4 }
  0x68   : > { %511 = sbr.rel (%p508_p8) target bundleno = 616 (0x268), region = 129  ;;  %p618_p11 = scmp.lt.s32.totalorder (!%p508_p8), %s1331_s15, 31 }
  0x69   : > { %p591_p9 = scmp.lt.s32.totalorder (!%p508_p8), %s2068_s0, 8  ;;  %p614_p12 = scmp.lt.s32.totalorder (!%p508_p8), %s1787_s28, 1 }
  0x6a   : > { %s514_s11 = sand.u32 (!%p508_p8), 1, %s1779_s26   ;;  %s521_s26 = sand.u32 (!%p508_p8), 1, %s1771_s24  }
  0x6b   : > { %s1328_s17 = sshll.u32 (!%p508_p8), %s521_s26, 4 }
  0x6c   : > { %s523_s8 = scalar_lea.vmem (!%p508_p8), [#allocation3], %s1328_s17 }
  0x6d   : > { %v1869_v11 = vmov 0   ;;  %s592_s27 = scalar_select %p591_p9, %s2068_s0, 8  ;;  %vm862_vm2 = vcmask 261120  }
  0x6e   : > { %1660 = vset.pattern.permute.xlu1 %v1869_v11  ;;  %1659 = vset.pattern.permute.xlu0 %v1869_v11  ;;  %s2288_s15 = smov (!%p618_p11, %s1331_s15), 31  ;;  %s1400_s12 = smul.u32 (%p1991_p10), 12, %s1791_s29 }
  0x6f   : > { %1661 = vset.pattern.permute.xlu2 %v1869_v11  ;;  %s1329_s20 = sshll.u32 %s592_s27, 3  ;;  %s1332_s23 = sshll.u32 %s2288_s15, 2 }
  0x70   : > { %s608_s22 = scalar_lea.vmem %s2236_s2, %s1329_s20  ;;  %s594_s16 = scalar_lea.vmem %s2235_s1, %s1329_s20 }
  0x71   : > { %v683_v12 = vld [vmem:[%s608_s22] sm:$0xff]  ;;  %v643_v14 = vld [vmem:[%s594_s16 + $0x10] sm:$0xff]  ;;  %v684_v15 = vld [vmem:[%s608_s22 + $0x8] sm:$0xff]  ;;  %s621_s19 = scalar_lea.vmem %s2238_s4, %s1332_s23  ;;  %s2088_s27 = smul.u32 24, %s514_s11 }
  0x72   : > { %v641_v13 = vld [vmem:[%s594_s16] sm:$0xff]  ;;  %691 = vperm.xlu1 %1660, %v683_v12   ;;  %659 = vperm.xlu2 %1661, %v643_v14   ;;  %v642_v16 = vld [vmem:[%s594_s16 + $0x8] sm:$0xff]  ;;  %v644_v17 = vld [vmem:[%s594_s16 + $0x18] sm:$0xff]  ;;  %s615_s14 = scalar_select %p614_p12, %s1787_s28, 1 }
  0x73   : > { %649 = vperm.xlu0 %1659, %v641_v13   ;;  %v686_v18 = vld [vmem:[%s608_s22 + $0x18] sm:$0xff]  ;;  %v685_v19 = vld [vmem:[%s608_s22 + $0x10] sm:$0xff]  ;;  %v645_v20 = vld [vmem:[%s594_s16 + $0x20] sm:$0xff]  ;;  %s2138_s24 = scalar_lea.vmem [#allocation4], %s2088_s27   ;;  %s946_s23 = ssub.s32 (%p1991_p10), 9, %s2068_s0 }
  0x74   : > { %v687_v21 = vld [vmem:[%s608_s22 + $0x20] sm:$0xff]  ;;  %v646_v22 = vld [vmem:[%s594_s16 + $0x28] sm:$0xff]  ;;  %v1397_v24 = vld [vmem:[%s621_s19 + $0x38] sm:$0xff]  ;;  %s616_s18 = scalar_lea.vmem %s2237_s3, %s615_s14  ;;  %p947_p13 = scmp.lt.s32.totalorder (%p1991_p10), %s946_s23, 6 }
  0x75   : > { %v688_v23 = vld [vmem:[%s608_s22 + $0x28] sm:$0xff]  ;;  %809 = vmatpush.bf16.msra.mxu0 %v1397_v24  ;;  %v1396_v25 = vld [vmem:[%s621_s19 + $0x30] sm:$0xff]  ;;  %1432 = vmatpush.bf16.msra.mxu2 %v1397_v24  ;;  %v1394_v27 = vld [vmem:[%s621_s19 + $0x20] sm:$0xff]  ;;  %s516_s22 = scalar_lea.vmem [#allocation2], %s2088_s27  ;;  %s952_s10 = sadd.s32 (%p1991_p10), %s1787_s28, %s1400_s12 }
  0x76   : > { %1433 = vmatpush.bf16.msra.mxu3 %v1397_v24  ;;  %v1395_v26 = vld [vmem:[%s621_s19 + $0x28] sm:$0xff]  ;;  %v1393_v28 = vld [vmem:[%s621_s19 + $0x18] sm:$0xff]  ;;  %v1392_v29 = vld [vmem:[%s621_s19 + $0x10] sm:$0xff] }
  0x77   : > { %v1391_v30 = vld [vmem:[%s621_s19 + $0x8] sm:$0xff]  ;;  %v1390_v31 = vld [vmem:[%s621_s19] sm:$0xff]  ;;  %s1379_s19 = sshll.u32 (%p1991_p10), %s952_s10, 2 }
  0x78   : > { %v725_v32 = vld [vmem:[%s616_s18] sm:$0x1]  ;;  %v1429_v59 = vld [vmem:[%s516_s22 + $0x10] sm:$0xff]   ;;  %s2162_s20 = scalar_lea.vmem (%p1991_p10), %s2241_s7, %s1379_s19  }
  0x79   : > { %810 = vmatpush.bf16.msra.mxu0 %v1396_v25  ;;  %1434 = vmatpush.bf16.msra.mxu2 %v1396_v25  ;;  %v1402_v34 = vld [vmem:[%s516_s22] sm:$0xff]   ;;  %vm726_vm0 = vcmp.gt.f32.partialorder %v725_v32, 0.0  ;;  %v1428_v45 = vld [vmem:[%s516_s22 + $0x8] sm:$0xff]   ;;  %v1411_v1 = vunpack.c.l.bf16 %v1429_v59  ;;  %v1412_v6 = vunpack.c.h.bf16 %v1429_v59 }
  0x7a   : > { %696 = vperm.xlu1 %1660, %v684_v15   ;;  %664 = vperm.xlu2 %1661, %v644_v17   ;;  %v1403_v35 = vunpack.c.l.bf16 %v1402_v34  ;;  %v727_v38 = vsel %vm726_vm0, 1, %v1869_v11  ;;  %v1404_v42 = vunpack.c.h.bf16 %v1402_v34  ;;  %v1407_v49 = vunpack.c.l.bf16 %v1428_v45 }
  0x7b   : > { %654 = vperm.xlu0 %1659, %v642_v16   ;;  %1435 = vmatpush.bf16.msra.mxu3 %v1396_v25  ;;  %v728_v40 = vperm.slane %v727_v38, 0  ;;  %v1408_v50 = vunpack.c.h.bf16 %v1428_v45 }
  0x7d   : > { %811 = vmatpush.bf16.msra.mxu0 %v1395_v26  ;;  %1436 = vmatpush.bf16.msra.mxu2 %v1395_v26  ;;  %vm2095_vm1 = vcmp.eq.s32.totalorder %v728_v40, 1 }
  0x7f   : > { %1437 = vmatpush.bf16.msra.mxu3 %v1395_v26 }
  0x81   : > { %812 = vmatpush.bf16.msra.mxu0 %v1394_v27  ;;  %1438 = vmatpush.bf16.msra.mxu2 %v1394_v27 }
  0x82   : > { %706 = vperm.xlu1 %1660, %v686_v18   ;;  %669 = vperm.xlu2 %1661, %v645_v20   ;;  %v1399_v20 = vld [vmem:[%s523_s8 + $0x8] sm:$0xff] }
  0x83   : > { %701 = vperm.xlu0 %1659, %v685_v19   ;;  %1439 = vmatpush.bf16.msra.mxu3 %v1394_v27 }
  0x84   : > { %878 = vmatpush.bf16.msra.mxu1 %v1399_v20 }
  0x85   : > { %813 = vmatpush.bf16.msra.mxu0 %v1393_v28  ;;  %1440 = vmatpush.bf16.msra.mxu2 %v1393_v28 }
  0x87   : > { %1441 = vmatpush.bf16.msra.mxu3 %v1393_v28 }
  0x89   : > { %814 = vmatpush.bf16.msra.mxu0 %v1392_v29  ;;  %1442 = vmatpush.bf16.msra.mxu2 %v1392_v29 }
  0x8a   : > { %711 = vperm.xlu1 %1660, %v687_v21   ;;  %716 = vperm.xlu2 %1661, %v688_v23   ;;  %v1398_v21 = vld [vmem:[%s523_s8] sm:$0xff] }
  0x8b   : > { %674 = vperm.xlu0 %1659, %v646_v22   ;;  %1443 = vmatpush.bf16.msra.mxu3 %v1392_v29  ;;  %v1662_v23 = vld [vmem:[%s2239_s5] ss:$0 sm:$0xff] }
  0x8c   : > { %879 = vmatpush.bf16.msra.mxu1 %v1398_v21 }
  0x8d   : > { %815 = vmatpush.bf16.msra.mxu0 %v1391_v30  ;;  %1444 = vmatpush.bf16.msra.mxu2 %v1391_v30 }
  0x8f   : > { %1445 = vmatpush.bf16.msra.mxu3 %v1391_v30 }
  0x91   : > { %816 = vmatpush.bf16.msra.mxu0 %v1390_v31  ;;  %1446 = vmatpush.bf16.msra.mxu2 %v1390_v31 }
  0x93   : > { %1447 = vmatpush.bf16.msra.mxu3 %v1390_v31 }
  0xcc   : > { %v660_v33 = vpop.permute.xlu2 %659 }
  0xcd   : > { %v679_v56 = vmul.f32 %v1407_v49, %v660_v33 }
  0xd4   : > { %v665_v41 = vpop.permute.xlu2 %664 }
  0xd5   : > { %v680_v57 = vmul.f32 %v1408_v50, %v665_v41 }
  0xdc   : > { %v670_v58 = vpop.permute.xlu2 %669 }
  0xdd   : > { %v681_v8 = vmul.f32 %v1411_v1, %v670_v58 }
  0xe4   : > { %v692_v36 = vpop.permute.xlu1 %691  ;;  %v717_v13 = vpop.permute.xlu2 %716 }
  0xe5   : > { %v650_v37 = vpop.permute.xlu0 %649 }
  0xe6   : > { %v677_v39 = vmul.f32 %v1403_v35, %v650_v37 }
  0xe8   : > { %v719_v43 = vadd.f32 %v692_v36, %v677_v39 }
  0xea   : > { %v2101_v51 = vsel %vm2095_vm1, %v719_v43, 0.0 }
  0xeb   : > { %v736_v54 = vand.u32 2147483647, %v2101_v51  ;;  %vm902_vm3 = vcmp.lt.f32.partialorder %v2101_v51, 0.0  ;;  %vm896_vm5 = vcmp.gt.f32.partialorder %v2101_v51, 0.0 }
  0xec   : > { %v697_v46 = vpop.permute.xlu1 %696 }
  0xed   : > { %v655_v47 = vpop.permute.xlu0 %654 }
  0xee   : > { %v678_v48 = vmul.f32 %v1404_v42, %v655_v47 }
  0xf0   : > { %v720_v52 = vadd.f32 %v697_v46, %v678_v48 }
  0xf2   : > { %v2105_v53 = vsel %vm2095_vm1, %v720_v52, 0.0 }
  0xf3   : > { %v737_v55 = vand.u32 2147483647, %v2105_v53  ;;  %vm903_vm4 = vcmp.lt.f32.partialorder %v2105_v53, 0.0  ;;  %vm897_vm6 = vcmp.gt.f32.partialorder %v2105_v53, 0.0 }
  0xf4   : > { %v707_v60 = vpop.permute.xlu1 %706 }
  0xf5   : > { %v702_v61 = vpop.permute.xlu0 %701  ;;  %v742_v62 = vpack.c.bf16 %v737_v55, %v736_v54  ;;  %v722_v63 = vadd.f32 %v707_v60, %v680_v57 }
  0xf6   : > { %v721_v0 = vadd.f32 %v702_v61, %v679_v56 }
  0xf7   : > { %817 = vmatmul.bf16.vlgmr.msra.gmra.mxu0 %v742_v62  ;;  %v2111_v2 = vsel %vm2095_vm1, %v722_v63, 0.0 }
  0xf8   : > { %v2115_v3 = vsel %vm2095_vm1, %v721_v0, 0.0  ;;  %v739_v5 = vand.u32 2147483647, %v2111_v2  ;;  %vm905_vm8 = vcmp.lt.f32.partialorder %v2111_v2, 0.0  ;;  %vm899_vm10 = vcmp.gt.f32.partialorder %v2111_v2, 0.0 }
  0xf9   : > { %v738_v4 = vand.u32 2147483647, %v2115_v3  ;;  %vm904_vm7 = vcmp.lt.f32.partialorder %v2115_v3, 0.0  ;;  %vm898_vm9 = vcmp.gt.f32.partialorder %v2115_v3, 0.0 }
  0xfb   : > { %v743_v7 = vpack.c.bf16 %v739_v5, %v738_v4 }
  0xfc   : > { %v712_v9 = vpop.permute.xlu1 %711 }
  0xfd   : > { %v675_v10 = vpop.permute.xlu0 %674  ;;  %822 = vmatmul.bf16.vlgmr.msra.gmra.mxu2 %v743_v7  ;;  %v723_v11 = vadd.f32 %v712_v9, %v681_v8 }
  0xfe   : > { %v682_v12 = vmul.f32 %v1412_v6, %v675_v10 }
  0xff   : > { %v2121_v14 = vsel %vm2095_vm1, %v723_v11, 0.0 }
 0x100   : > { %v724_v15 = vadd.f32 %v717_v13, %v682_v12  ;;  %v740_v17 = vand.u32 2147483647, %v2121_v14  ;;  %vm906_vm11 = vcmp.lt.f32.partialorder %v2121_v14, 0.0  ;;  %vm900_vm13 = vcmp.gt.f32.partialorder %v2121_v14, 0.0 }
 0x102   : > { %v2125_v16 = vsel %vm2095_vm1, %v724_v15, 0.0 }
 0x103   : > { %v741_v18 = vand.u32 2147483647, %v2125_v16  ;;  %vm907_vm12 = vcmp.lt.f32.partialorder %v2125_v16, 0.0  ;;  %vm901_vm14 = vcmp.gt.f32.partialorder %v2125_v16, 0.0 }
 0x105   : > { %v744_v19 = vpack.c.bf16 %v741_v18, %v740_v17 }
 0x107   : > { %827 = vmatmul.bf16.vlgmr.msra.gmra.mxu3 %v744_v19 }
 0x174   : > { %v818_v22 = vpop.f32.mrf.mxu0 }
 0x175   : > { %v837_v25 = vmul.f32 %v1662_v23, %v818_v22 }
 0x17c   : > { %v820_v24 = vpop.f32.mrf.mxu0 }
 0x17d   : > { %v838_v26 = vmul.f32 %v1662_v23, %v820_v24 }
 0x17f   : > { %v843_v27 = vpack.c.bf16 %v838_v26, %v837_v25 }
 0x180   : > { %v823_v28 = vpop.f32.mrf.mxu2 }
 0x181   : > { %1373 = vmatmul.msk.bf16.vlgmr.msra.gmra.mxu1 %vm862_vm2, %v843_v27  ;;  %v839_v31 = vmul.f32 %v1662_v23, %v823_v28 }
 0x188   : > { %v825_v29 = vpop.f32.mrf.mxu2 }
 0x189   : > { %v840_v30 = vmul.f32 %v1662_v23, %v825_v29 }
 0x18a   : > { %v828_v32 = vpop.f32.mrf.mxu3 }
 0x18b   : > { %v844_v33 = vpack.c.bf16 %v840_v30, %v839_v31  ;;  %v841_v36 = vmul.f32 %v1662_v23, %v828_v32 }
 0x191   : > { %1374 = vmatmul.msk.bf16.gmra.mxu1 %vm862_vm2, %v844_v33 }
 0x192   : > { %v830_v34 = vpop.f32.mrf.mxu3 }
 0x193   : > { %v842_v35 = vmul.f32 %v1662_v23, %v830_v34 }
 0x195   : > { %v845_v37 = vpack.c.bf16 %v842_v35, %v841_v36 }
 0x1a1   : > { %1375 = vmatmul.msk.bf16.gmra.mxu1 %vm862_vm2, %v845_v37 }
 0x1fe   : > { %v881_v38 = vpop.f32.mrf.mxu1 }
 0x1ff   : > { %v908_v39 = vsub.f32 0.0, %v881_v38 }
 0x201   : > { %v914_v41 = vsel %vm902_vm3, %v908_v39, 0.0 }
 0x202   : > { %v920_v44 = vsel %vm896_vm5, %v881_v38, %v914_v41 }
 0x206   : > { %v883_v40 = vpop.f32.mrf.mxu1 }
 0x207   : > { %v909_v42 = vsub.f32 0.0, %v883_v40 }
 0x209   : > { %v915_v43 = vsel %vm903_vm4, %v909_v42, 0.0 }
 0x20a   : > { %v921_v45 = vsel %vm897_vm6, %v883_v40, %v915_v43 }
 0x20b   : > { %v1416_v46 = vpack.c.bf16 %v921_v45, %v920_v44 }
 0x20d   : > { %1417 = vst [vmem:[%s2138_s24] sm:$0xff] %v1416_v46  }
 0x20e   : > { %v886_v47 = vpop.f32.mrf.mxu1 }
 0x20f   : > { %v910_v48 = vsub.f32 0.0, %v886_v47 }
 0x211   : > { %v916_v50 = vsel %vm904_vm7, %v910_v48, 0.0 }
 0x212   : > { %v922_v53 = vsel %vm898_vm9, %v886_v47, %v916_v50 }
 0x216   : > { %v888_v49 = vpop.f32.mrf.mxu1 }
 0x217   : > { %v911_v52 = vsub.f32 0.0, %v888_v49 }
 0x219   : > { %v917_v51 = vsel %vm905_vm8, %v911_v52, 0.0 }
 0x21a   : > { %v923_v54 = vsel %vm899_vm10, %v888_v49, %v917_v51 }
 0x21b   : > { %v1421_v55 = vpack.c.bf16 %v923_v54, %v922_v53 }
 0x21d   : > { %1430 = vst [vmem:[%s2138_s24 + $0x8] sm:$0xff] %v1421_v55  }
 0x21e   : > { %v891_v56 = vpop.f32.mrf.mxu1 }
 0x21f   : > { %v912_v57 = vsub.f32 0.0, %v891_v56 }
 0x221   : > { %v918_v59 = vsel %vm906_vm11, %v912_v57, 0.0 }
 0x222   : > { %v924_v62 = vsel %vm900_vm13, %v891_v56, %v918_v59 }
 0x226   : > { %v893_v58 = vpop.f32.mrf.mxu1 }
 0x227   : > { %v913_v60 = vsub.f32 0.0, %v893_v58 }
 0x229   : > { %v919_v61 = vsel %vm907_vm12, %v913_v60, 0.0  ;;  %944 = sbr.rel (!%p1991_p10) target bundleno = 616 (0x268), region = 141 }
 0x22a   : > { %v925_v63 = vsel %vm901_vm14, %v893_v58, %v919_v61 }
 0x22b   : > { %v1426_v0 = vpack.c.bf16 %v925_v63, %v924_v62 }
 0x22d   : > { %1431 = vst [vmem:[%s2138_s24 + $0x10] sm:$0xff] %v1426_v0  }
 0x22e   : > { %s2290_s23 = smov (!%p947_p13, %s946_s23), 6 }
 0x22f   : > { %s1376_s11 = sshll.u32 %s2290_s23, 2 }
 0x230   : > { %p1380_p0 = scmp.eq.s32.totalorder %s1376_s11, 0 }
 0x231   : > { %1663 = sdivrem.u32 (!%p1380_p0), %s2290_s23, 6 }
 0x232   : > { %957 = sbr.rel (%p1380_p0) target bundleno = 616 (0x268), region = 145 }
 0x23a   : > { %s2165_s21 = spop.drf %1663 }
 0x23b   : > { %s1665_s0 = spop.drf %1663  ;;  %p1381_p10 = scmp.le.s32.totalorder %s2165_s21, 0 }
 0x23c   : > { %s2262_s28 = smov (!%p1381_p10), %s2162_s20  ;;  %s2263_s29 = smov (!%p1381_p10), %s2138_s24 }
 0x23d   : > { %1225 = sbr.rel (%p1381_p10) target bundleno = 590 (0x24e), region = 272  ;;  %s2174_s13 = smov (!%p1381_p10), 0  }
 0x23e   : > { %s2176_s18 = smov (!%p1381_p10), 0  }
 0x242 LB: >> { %v975_v1 = vld [vmem:[%s1843_s29] sm:$0xf]  ;;  %v977_v2 = vld [vmem:[%s1843_s29 + $0x4] sm:$0xf]  ;;  %v979_v3 = vld [vmem:[%s1843_s29 + $0x8] sm:$0xf]  ;;  %s1851_s18 = sphi %s2176_s18, %s969_s18   ;;  %s1847_s13 = sphi %s2174_s13, %s2264_s13   ;;  %s1843_s29 = sphi %s2263_s29, %s992_s29   ;;  %s1839_s28 = sphi %s2262_s28, %s993_s28  }
 0x243   : >> { %976 = vst [vmem:[%s1839_s28] sm:$0xf] %v975_v1  ;;  %v981_v4 = vld [vmem:[%s1843_s29 + $0xc] sm:$0xf]  ;;  %s987_s22 = sadd.s32 1, %s1847_s13  ;;  %v983_v5 = vld [vmem:[%s1843_s29 + $0x10] sm:$0xf] }
 0x244   : >> { %978 = vst [vmem:[%s1839_s28 + $0x8] sm:$0xf] %v977_v2  ;;  %p988_p1 = scmp.ge.s32.totalorder %s987_s22, %s2165_s21  ;;  %v985_v6 = vld [vmem:[%s1843_s29 + $0x14] sm:$0xf]  ;;  %s969_s18 = sadd.s32 1, %s1851_s18  }
 0x245   : >> { %980 = vst [vmem:[%s1839_s28 + $0x10] sm:$0xf] %v979_v3  ;;  %p968_p2 = scmp.ge.s32.totalorder %s969_s18, %s2165_s21 }
 0x246   : >> { %982 = vst [vmem:[%s1839_s28 + $0x18] sm:$0xf] %v981_v4  ;;  %s2292_s22 = smov (%p988_p1, %s987_s22), 0 }
 0x247   : >> { %984 = vst [vmem:[%s1839_s28 + $0x20] sm:$0xf] %v983_v5  ;;  %s990_s26 = smul.u32 24, %s2292_s22  ;;  %s2264_s13 = smov %s2292_s22 }
 0x248   : >> { %986 = vst [vmem:[%s1839_s28 + $0x28] sm:$0xf] %v985_v6  ;;  %s991_s17 = smul.u32 48, %s2292_s22 }
 0x249   : >> { %s992_s29 = scalar_lea.vmem %s2138_s24, %s990_s26 [#allocation4]   ;;  %971 = sbr.rel (!%p968_p2) target bundleno = 578 (0x242), region = 278 }
 0x24a   : >> { %s993_s28 = scalar_lea.vmem %s2162_s20, %s991_s17  }
 0x24e PF: > { %1666 = sdivrem.u32 %s2290_s23, 6 }
 0x24f   : > { %s1382_s8 = smul.u32 24, %s2165_s21 }
 0x250   : > { %s1383_s16 = smul.u32 48, %s2165_s21 }
 0x251   : > { %s2198_s15 = scalar_lea.vmem %s2138_s24, %s1382_s8 [#allocation4]  }
 0x252   : > { %s2201_s12 = scalar_lea.vmem %s2162_s20, %s1383_s16  }
 0x257   : > { %s1667_s10 = spop.drf %1666 }
 0x258   : > { %s1668_s19 = spop.drf %1666 }
 0x259   : > { %p1384_p3 = scmp.le.s32.totalorder %s1668_s19, 0 }
 0x25a   : > { %s1853_s11 = smov (!%p1384_p3), %s2201_s12   ;;  %s1857_s14 = smov (!%p1384_p3), %s2198_s15  }
 0x25b   : > { %1239 = sbr.rel (%p1384_p3) target bundleno = 616 (0x268), region = 283  ;;  %s1861_s27 = smov (!%p1384_p3), 0  }
 0x25c   : > { %s1865_s0 = smov (!%p1384_p3), 0  }
 0x260 LB: >> { %v1010_v7 = vld [vmem:[%s1859_s14] sm:$0xf]  ;;  %s1012_s24 = sadd.s32 1, %s1863_s27  ;;  %s1004_s0 = sadd.s32 1, %s1867_s0   ;;  %s1867_s0 = sphi %s1865_s0, %s1004_s0   ;;  %s1863_s27 = sphi %s1861_s27, %s1862_s27   ;;  %s1859_s14 = sphi %s1857_s14, %s1017_s14   ;;  %s1855_s11 = sphi %s1853_s11, %s1018_s11  }
 0x261   : >> { %1011 = vst [vmem:[%s1855_s11] sm:$0xf] %v1010_v7  ;;  %p1013_p4 = scmp.ge.s32.totalorder %s1012_s24, %s1668_s19  ;;  %p1003_p5 = scmp.ge.s32.totalorder %s1004_s0, %s1668_s19 }
 0x263   : >> { %s2294_s24 = smov (%p1013_p4, %s1012_s24), 0  ;;  %1006 = sbr.rel (!%p1003_p5) target bundleno = 608 (0x260), region = 289 }
 0x264   : >> { %s1385_s23 = sshll.u32 %s2294_s24, 2  ;;  %s1386_s20 = sshll.u32 %s2294_s24, 3 }
 0x265   : >> { %s1017_s14 = scalar_lea.vmem %s2198_s15, %s1385_s23 [#allocation4]   ;;  %s1018_s11 = scalar_lea.vmem %s2201_s12, %s1386_s20  }
 0x266   : >> { %s1862_s27 = smov %s2294_s24  }
 0x268 PF: > { %s17_s9 = sadd.s32 1, %s1803_s9   ;;  %s2265_s21 = sld [smem:[#allocation9_spill]] }
 0x269   : > { %p14_p6 = scmp.ge.s32.totalorder %s17_s9, 6   ;;  %s2266_s26 = sld [smem:[#allocation5_spill]] }
 0x26a   : > { %s2267_s27 = sld [smem:[#allocation10_spill]]  ;;  %s2271_s24 = smov %s1775_s25 }
 0x26b   : > { %s2268_s29 = sld [smem:[#allocation6_spill]]  ;;  %s2273_s28 = smov %s1795_s30 }
 0x26c   : > { %s2269_s13 = sld [smem:[#allocation7_spill]] }
 0x26d   : > { %s2270_s8 = sld [smem:[#allocation8_spill]] }
 0x26e   : > { %s2272_s25 = smov %s2265_s21  ;;  %16 = sbr.rel (!%p14_p6) target bundleno = 7 (0x7), region = 300 }
 0x272   : > { %s2274_s30 = smov %s2269_s13 }

// kernel: _hbpass_conv_forward.3
= control target key start
LH: loop header
LB: loop body
LE: loop exit
PB: predicated region body
PF: predicated region fallthrough
CT: control target
= control target key end

     0   :  { %s536_s12 = smov 0   ;;  %s595_s0 = inlined_call_operand.vmem [shape: bf16[512,36], index: 0, kind: input, shape index: {}]   ;;  %s596_s1 = inlined_call_operand.vmem [shape: bf16[36,128], index: 1, kind: input, shape index: {}]   ;;  %s597_s2 = inlined_call_operand.vmem [shape: f32[1,128], index: 2, kind: input, shape index: {}]   ;;  %s598_s3 = inlined_call_operand.vmem [shape: f32[512,128], index: 3, kind: output, shape index: {}]  }
   0x1 LB: > { %s421_s13 = sadd.s32 4294967295, %s514_s12   ;;  %p425_p0 = scmp.ge.s32.totalorder %s514_s12, 1  ;;  %s514_s12 = sphi %s536_s12, %s13_s12  }
   0x2   : > { %p138_p1 = scmp.lt.s32.totalorder %s514_s12, 5 }
   0x4   : > { %p139_p2 = pnand %p425_p0, %p138_p1 }
   0x5   : > { %s426_s16 = sshll.u32 (!%p139_p2), %s421_s13, 4 }
   0x6   : > { %142 = sbr.rel (%p139_p2) target bundleno = 191 (0xbf), region = 32  ;;  %p163_p3 = scmp.lt.s32.totalorder (!%p139_p2), %s426_s16, 63 }
   0xb   : > { %v195_v0 = vld [vmem:[%s596_s1 + $0x10] sm:$0x3]  ;;  %vm280_vm0 = vcmask 1041408   ;;  %s600_s16 = smov (!%p163_p3, %s426_s16), 63  ;;  %v489_v4 = vld [vmem:[%s596_s1 + $0x8] sm:$0xff]  ;;  %v488_v5 = vld [vmem:[%s596_s1] sm:$0xff] }
   0xc   : > { %v249_v1 = vunpack.c.l.b16 %v195_v0  ;;  %s427_s19 = sshll.u32 %s600_s16, 2  ;;  %vm255_vm1 = vcmask 293888   ;;  %v507_v14 = vld [vmem:[%s597_s2] ss:$0 sm:$0xff]  ;;  %s429_s27 = sshll.u32 %s600_s16, 3 }
   0xd   : > { %s166_s24 = scalar_lea.vmem %s595_s0, %s427_s19  ;;  %s574_s30 = scalar_lea.vmem %s598_s3, %s429_s27 }
   0xe   : > { %v252_v2 = vpack.c.b16 %v249_v1, %v249_v1  ;;  %v480_v6 = vld [vmem:[%s166_s24] sm:$0xff]  ;;  %v482_v7 = vld [vmem:[%s166_s24 + $0x10] sm:$0xff]  ;;  %v481_v10 = vld [vmem:[%s166_s24 + $0x8] sm:$0xff] }
   0xf   : > { %v484_v8 = vld [vmem:[%s166_s24 + $0x20] sm:$0xff]  ;;  %v486_v9 = vld [vmem:[%s166_s24 + $0x30] sm:$0xff]  ;;  %v483_v11 = vld [vmem:[%s166_s24 + $0x18] sm:$0xff] }
  0x10   : > { %v282_v3 = vsel %vm280_vm0, %v252_v2, 0  ;;  %v485_v12 = vld [vmem:[%s166_s24 + $0x28] sm:$0xff]  ;;  %v487_v13 = vld [vmem:[%s166_s24 + $0x38] sm:$0xff] }
  0x11   : > { %289 = vmatpush.bf16.msra.mxu0 %v282_v3  ;;  %490 = vmatpush.bf16.msra.mxu1 %v282_v3 }
  0x12   : > { %491 = vmatpush.bf16.msra.mxu2 %v282_v3  ;;  %492 = vmatpush.bf16.msra.mxu3 %v282_v3 }
  0x15   : > { %290 = vmatpush.bf16.msra.mxu0 %v489_v4  ;;  %493 = vmatpush.bf16.msra.mxu1 %v489_v4 }
  0x16   : > { %494 = vmatpush.bf16.msra.mxu2 %v489_v4  ;;  %495 = vmatpush.bf16.msra.mxu3 %v489_v4 }
  0x19   : > { %291 = vmatpush.bf16.msra.mxu0 %v488_v5  ;;  %496 = vmatpush.bf16.msra.mxu1 %v488_v5 }
  0x1a   : > { %497 = vmatpush.bf16.msra.mxu2 %v488_v5  ;;  %498 = vmatpush.bf16.msra.mxu3 %v488_v5 }
  0x1c   : > { %470 = vmatmul.msk.bf16.vlgmr.msra.gmra.mxu0 %vm255_vm1, %v480_v6  ;;  %472 = vmatmul.msk.bf16.vlgmr.msra.gmra.mxu1 %vm255_vm1, %v482_v7 }
  0x1d   : > { %474 = vmatmul.msk.bf16.vlgmr.msra.gmra.mxu2 %vm255_vm1, %v484_v8  ;;  %476 = vmatmul.msk.bf16.vlgmr.msra.gmra.mxu3 %vm255_vm1, %v486_v9 }
  0x2c   : > { %471 = vmatmul.msk.bf16.gmra.mxu0 %vm255_vm1, %v481_v10  ;;  %473 = vmatmul.msk.bf16.gmra.mxu1 %vm255_vm1, %v483_v11 }
  0x2d   : > { %475 = vmatmul.msk.bf16.gmra.mxu2 %vm255_vm1, %v485_v12  ;;  %477 = vmatmul.msk.bf16.gmra.mxu3 %vm255_vm1, %v487_v13 }
  0x99   : > { %v293_v15 = vpop.f32.mrf.mxu0  ;;  %v303_v16 = vpop.f32.mrf.mxu1 }
  0x9a   : > { %v294_v17 = vadd.f32 %v507_v14, %v293_v15  ;;  %v304_v18 = vadd.f32 %v507_v14, %v303_v16 }
  0x9c   : > { %v333_v19 = vmax.f32 %v294_v17, 0.0  ;;  %v337_v20 = vmax.f32 %v304_v18, 0.0 }
  0x9e   : > { %349 = vst [vmem:[%s574_s30] sm:$0xff] %v333_v19 }
  0x9f   : > { %353 = vst [vmem:[%s574_s30 + $0x20] sm:$0xff] %v337_v20 }
  0xa0   : > { %v313_v21 = vpop.f32.mrf.mxu2  ;;  %v323_v22 = vpop.f32.mrf.mxu3 }
  0xa1   : > { %v314_v23 = vadd.f32 %v507_v14, %v313_v21  ;;  %v324_v24 = vadd.f32 %v507_v14, %v323_v22  ;;  %v295_v25 = vpop.f32.mrf.mxu0  ;;  %v305_v26 = vpop.f32.mrf.mxu1 }
  0xa2   : > { %v296_v27 = vadd.f32 %v507_v14, %v295_v25  ;;  %v306_v28 = vadd.f32 %v507_v14, %v305_v26 }
  0xa3   : > { %v341_v29 = vmax.f32 %v314_v23, 0.0  ;;  %v345_v30 = vmax.f32 %v324_v24, 0.0 }
  0xa4   : > { %v334_v31 = vmax.f32 %v296_v27, 0.0  ;;  %v338_v32 = vmax.f32 %v306_v28, 0.0 }
  0xa5   : > { %357 = vst [vmem:[%s574_s30 + $0x40] sm:$0xff] %v341_v29 }
  0xa6   : > { %361 = vst [vmem:[%s574_s30 + $0x60] sm:$0xff] %v345_v30 }
  0xa7   : > { %350 = vst [vmem:[%s574_s30 + $0x8] sm:$0xff] %v334_v31 }
  0xa8   : > { %354 = vst [vmem:[%s574_s30 + $0x28] sm:$0xff] %v338_v32  ;;  %v315_v33 = vpop.f32.mrf.mxu2  ;;  %v325_v34 = vpop.f32.mrf.mxu3 }
  0xa9   : > { %v316_v35 = vadd.f32 %v507_v14, %v315_v33  ;;  %v326_v36 = vadd.f32 %v507_v14, %v325_v34  ;;  %v298_v37 = vpop.f32.mrf.mxu0  ;;  %v308_v38 = vpop.f32.mrf.mxu1 }
  0xaa   : > { %v299_v39 = vadd.f32 %v507_v14, %v298_v37  ;;  %v309_v40 = vadd.f32 %v507_v14, %v308_v38 }
  0xab   : > { %v342_v41 = vmax.f32 %v316_v35, 0.0  ;;  %v346_v42 = vmax.f32 %v326_v36, 0.0 }
  0xac   : > { %v335_v43 = vmax.f32 %v299_v39, 0.0  ;;  %v339_v44 = vmax.f32 %v309_v40, 0.0 }
  0xad   : > { %358 = vst [vmem:[%s574_s30 + $0x48] sm:$0xff] %v342_v41 }
  0xae   : > { %362 = vst [vmem:[%s574_s30 + $0x68] sm:$0xff] %v346_v42 }
  0xaf   : > { %351 = vst [vmem:[%s574_s30 + $0x10] sm:$0xff] %v335_v43 }
  0xb0   : > { %355 = vst [vmem:[%s574_s30 + $0x30] sm:$0xff] %v339_v44  ;;  %v318_v45 = vpop.f32.mrf.mxu2  ;;  %v328_v46 = vpop.f32.mrf.mxu3 }
  0xb1   : > { %v319_v47 = vadd.f32 %v507_v14, %v318_v45  ;;  %v329_v48 = vadd.f32 %v507_v14, %v328_v46  ;;  %v300_v49 = vpop.f32.mrf.mxu0  ;;  %v310_v50 = vpop.f32.mrf.mxu1 }
  0xb2   : > { %v301_v51 = vadd.f32 %v507_v14, %v300_v49  ;;  %v311_v52 = vadd.f32 %v507_v14, %v310_v50 }
  0xb3   : > { %v343_v53 = vmax.f32 %v319_v47, 0.0  ;;  %v347_v54 = vmax.f32 %v329_v48, 0.0 }
  0xb4   : > { %v336_v55 = vmax.f32 %v301_v51, 0.0  ;;  %v340_v56 = vmax.f32 %v311_v52, 0.0 }
  0xb5   : > { %359 = vst [vmem:[%s574_s30 + $0x50] sm:$0xff] %v343_v53 }
  0xb6   : > { %363 = vst [vmem:[%s574_s30 + $0x70] sm:$0xff] %v347_v54 }
  0xb7   : > { %352 = vst [vmem:[%s574_s30 + $0x18] sm:$0xff] %v336_v55 }
  0xb8   : > { %356 = vst [vmem:[%s574_s30 + $0x38] sm:$0xff] %v340_v56  ;;  %v320_v57 = vpop.f32.mrf.mxu2  ;;  %v330_v58 = vpop.f32.mrf.mxu3 }
  0xb9   : > { %v321_v59 = vadd.f32 %v507_v14, %v320_v57  ;;  %v331_v60 = vadd.f32 %v507_v14, %v330_v58 }
  0xbb   : > { %v344_v61 = vmax.f32 %v321_v59, 0.0  ;;  %v348_v62 = vmax.f32 %v331_v60, 0.0 }
  0xbd   : > { %360 = vst [vmem:[%s574_s30 + $0x58] sm:$0xff] %v344_v61 }
  0xbe   : > { %364 = vst [vmem:[%s574_s30 + $0x78] sm:$0xff] %v348_v62 }
  0xbf PF: > { %s13_s12 = sadd.s32 1, %s514_s12  }
  0xc0   : > { %p10_p4 = scmp.ge.s32.totalorder %s13_s12, 6  }
  0xc2   :  { %12 = sbr.rel (!%p10_p4) target bundleno = 1 (0x1), region = 62 }

</bundles_post_ra>
